<compile_context>
chip_gen: v5e
topology: v5e:2x2
jax: 0.10.0
libtpu: 0.0.40
codegen_flags: <defaults>
</compile_context>

<pallas_src>
import functools

import jax
import jax.numpy as jnp
from jax.experimental import pallas as pl
from jax.experimental.pallas import tpu as pltpu

_LANE = 128
_VMEM_LIMIT_BYTES = 48 * 1024 * 1024      # safe on v5e/v6e (128 MiB) and v7x (64 MiB)
_RESIDENT_RHS_BYTES = 12 * 1024 * 1024    # hold rhs fully in VMEM below this size


def _round_up(x, m):
    return ((x + m - 1) // m) * m


def _pick_tile(n, candidates):
    """Largest candidate that divides n (n is always a multiple of 128)."""
    for c in candidates:
        if n % c == 0:
            return c
    return n


def _pick_row_tile(n_pad, f_mid_pad, f_out_pad):
    """Largest row tile dividing n_pad whose per-tile VMEM share stays modest."""
    for tm in (1024, 512, 256, 128):
        if n_pad % tm:
            continue
        # f32 accumulator + double-buffered output block
        per_tile = tm * f_mid_pad * 4 + 2 * tm * f_out_pad * 4
        if per_tile <= 8 * 1024 * 1024 or tm == 128:
            return tm
    return n_pad


def _const_block_spec(block_shape, index_map):
    """BlockSpec for a grid-invariant block; single-buffered when the API supports it."""
    try:
        return pl.BlockSpec(block_shape, index_map, pipeline_mode=pl.Buffered(1))
    except (TypeError, AttributeError):
        return pl.BlockSpec(block_shape, index_map)


# ---------------------------------------------------------------------------
# Pallas kernels
# ---------------------------------------------------------------------------
def _gcn_layer_body(a_ref, b_ref, w_ref, bias_ref, o_ref, acc_ref,
                    *, tk, resident_rhs, apply_relu):
    """Tiled  out = (A_hat @ B) [@ W] + bias  (+ReLU).

    Grid = (row_tiles, k_tiles).  acc_ref is a (tm, f_mid) f32 accumulator.
    If w_ref is not None: B == X (bf16) and W is applied in the finalize step.
    Else:                 B == X @ W (precomputed bf16).
    If resident_rhs: b_ref is the full (n_pad, f_mid) array held in VMEM and sliced here.
    """
    k = pl.program_id(1)

    @pl.when(k == 0)
    def _():
        acc_ref[...] = jnp.zeros_like(acc_ref)

    if resident_rhs:
        start = pl.multiple_of(k * tk, tk)
        b_tile = b_ref[pl.ds(start, tk), :]
    else:
        b_tile = b_ref[...]

    acc_ref[...] += jnp.dot(a_ref[...], b_tile,
                            preferred_element_type=jnp.float32)

    @pl.when(k == pl.num_programs(1) - 1)
    def _():
        out = acc_ref[...]
        if w_ref is not None:
            # bf16 MXU path with f32 accumulation for the finalize matmul.
            out = jnp.dot(out.astype(jnp.bfloat16), w_ref[...],
                          preferred_element_type=jnp.float32)
        out = out + bias_ref[...]              # (1, F_out) broadcasts over rows
        if apply_relu:
            out = jnp.maximum(out, 0.0)
        o_ref[...] = out.astype(o_ref.dtype)


def _gcn_layer_kernel_w(a_ref, b_ref, w_ref, bias_ref, o_ref, acc_ref, *,
                        tk, resident_rhs, apply_relu):
    _gcn_layer_body(a_ref, b_ref, w_ref, bias_ref, o_ref, acc_ref,
                    tk=tk, resident_rhs=resident_rhs, apply_relu=apply_relu)


def _gcn_layer_kernel_no_w(a_ref, b_ref, bias_ref, o_ref, acc_ref, *,
                           tk, resident_rhs, apply_relu):
    _gcn_layer_body(a_ref, b_ref, None, bias_ref, o_ref, acc_ref,
                    tk=tk, resident_rhs=resident_rhs, apply_relu=apply_relu)


def _xw_kernel(x_ref, w_ref, o_ref):
    """Row-tiled bf16 X @ W with f32 accumulation (feeds the A_hat contraction)."""
    o_ref[...] = jnp.dot(x_ref[...], w_ref[...],
                         preferred_element_type=jnp.float32).astype(o_ref.dtype)


# ---------------------------------------------------------------------------
# Pallas wrappers
# ---------------------------------------------------------------------------
def _matmul_rows_pallas(x_pad, w_pad, out_dtype=jnp.bfloat16):
    """Row-tiled X @ W, bf16 in / bf16 out."""
    n_pad, f_in_pad = x_pad.shape
    f_out_pad = w_pad.shape[1]
    tm = _pick_tile(n_pad, (512, 256, 128))
    # TODO(synk): tile f_out as well if f_in_pad*f_out_pad weights approach the VMEM budget.
    return pl.pallas_call(
        _xw_kernel,
        out_shape=jax.ShapeDtypeStruct((n_pad, f_out_pad), out_dtype),
        grid=(n_pad // tm,),
        in_specs=[
            pl.BlockSpec((tm, f_in_pad), lambda i: (i, 0)),
            _const_block_spec((f_in_pad, f_out_pad), lambda i: (0, 0)),
        ],
        out_specs=pl.BlockSpec((tm, f_out_pad), lambda i: (i, 0)),
        compiler_params=pltpu.CompilerParams(
            dimension_semantics=("parallel",),
            vmem_limit_bytes=_VMEM_LIMIT_BYTES),
    )(x_pad, w_pad)


def gcn_conv_pallas(a_hat_pad, x_pad, w, b, apply_relu, out_dtype):
    """One GCNConv layer, tiled over (rows of A_hat, reduction over nodes).

    a_hat_pad: (Np, Np) bf16 normalized adjacency (zero padded).
    x_pad:     (Np, F_in_pad) bf16 activations (zero padded, lane dense).
    Returns (Np, F_out_pad) activations in `out_dtype`.
    """
    n_pad = a_hat_pad.shape[0]
    f_in, f_out = w.shape
    f_in_pad = x_pad.shape[1]
    f_out_pad = _round_up(f_out, _LANE)

    w_pad = (jnp.zeros((f_in_pad, f_out_pad), jnp.bfloat16)
             .at[:f_in, :f_out].set(w.astype(jnp.bfloat16)))
    b_pad = (jnp.zeros((1, f_out_pad), jnp.float32)
             .at[:, :f_out].set(b.reshape(1, f_out)))

    # Matmul association: contract A_hat against the smaller feature dim.
    apply_w2 = f_in <= f_out
    if apply_w2:
        rhs = x_pad                                  # stream X (bf16); W in finalize
        f_mid_pad = f_in_pad
    else:
        rhs = _matmul_rows_pallas(x_pad, w_pad)      # precompute XW (bf16)
        f_mid_pad = f_out_pad

    tm = _pick_row_tile(n_pad, f_mid_pad, f_out_pad)
    tk = _pick_tile(n_pad, (2048, 1024, 512, 256, 128))

    # Hold the whole rhs in VMEM (read from HBM once) when it fits the budget;
    # this also leaves headroom for A_hat double-buffering on v7x's 64 MiB VMEM.
    resident_rhs = n_pad * f_mid_pad * 2 <= _RESIDENT_RHS_BYTES

    a_spec = pl.BlockSpec((tm, tk), lambda i, k: (i, k))
    if resident_rhs:
        rhs_spec = _const_block_spec((n_pad, f_mid_pad), lambda i, k: (0, 0))
    else:
        rhs_spec = pl.BlockSpec((tk, f_mid_pad), lambda i, k: (k, 0))
    bias_spec = _const_block_spec((1, f_out_pad), lambda i, k: (0, 0))
    out_spec = pl.BlockSpec((tm, f_out_pad), lambda i, k: (i, 0))

    if apply_w2:
        kernel = functools.partial(_gcn_layer_kernel_w, tk=tk,
                                   resident_rhs=resident_rhs, apply_relu=apply_relu)
        in_specs = [a_spec, rhs_spec,
                    _const_block_spec((f_in_pad, f_out_pad), lambda i, k: (0, 0)),
                    bias_spec]
        operands = (a_hat_pad, rhs, w_pad, b_pad)
    else:
        kernel = functools.partial(_gcn_layer_kernel_no_w, tk=tk,
                                   resident_rhs=resident_rhs, apply_relu=apply_relu)
        in_specs = [a_spec, rhs_spec, bias_spec]
        operands = (a_hat_pad, rhs, b_pad)

    return pl.pallas_call(
        kernel,
        out_shape=jax.ShapeDtypeStruct((n_pad, f_out_pad), out_dtype),
        grid=(n_pad // tm, n_pad // tk),
        in_specs=in_specs,
        out_specs=out_spec,
        scratch_shapes=[pltpu.VMEM((tm, f_mid_pad), jnp.float32)],
        compiler_params=pltpu.CompilerParams(
            dimension_semantics=("parallel", "arbitrary"),
            vmem_limit_bytes=_VMEM_LIMIT_BYTES),
    )(*operands)


# ---------------------------------------------------------------------------
# Glue: graph normalization (PyG gcn_norm with self loops) and parameter init
# ---------------------------------------------------------------------------
def build_normalized_adjacency(edge_index, num_nodes, num_nodes_pad):
    """Dense D^{-1/2}(A + I)D^{-1/2}, zero padded to (Np, Np), built directly in bf16."""
    src, tgt = edge_index[0], edge_index[1]
    # Degrees straight from the edge list (no dense f32 intermediate); +1 for self loop.
    deg = jnp.zeros((num_nodes,), jnp.float32).at[tgt].add(1.0) + 1.0
    dinv = jax.lax.rsqrt(deg)                       # deg >= 1 always (self loop)
    vals = (dinv[tgt] * dinv[src]).astype(jnp.bfloat16)
    a_hat = jnp.zeros((num_nodes_pad, num_nodes_pad), jnp.bfloat16)
    a_hat = a_hat.at[tgt, src].add(vals)            # edges (duplicates accumulate, like PyG)
    loops = jnp.arange(num_nodes)
    a_hat = a_hat.at[loops, loops].add((dinv * dinv).astype(jnp.bfloat16))  # self loops
    return a_hat


def init_gcn_params(key, in_features, hidden_dims):
    """Glorot-uniform weights, zero biases (PyG GCNConv defaults)."""
    dims = [in_features] + list(hidden_dims)
    params = []
    for i in range(len(hidden_dims)):
        f_in, f_out = dims[i], dims[i + 1]
        key, sub = jax.random.split(key)
        limit = jnp.sqrt(6.0 / (f_in + f_out))
        w = jax.random.uniform(sub, (f_in, f_out), jnp.float32, -limit, limit)
        b = jnp.zeros((f_out,), jnp.float32)
        params.append((w, b))
    return params


def gcn_forward(params, x, edge_index, num_nodes, dropout=0.0):
    """Mirrors GCN.forward. edge_index: [2, E] array or list of such arrays."""
    layerwise_adjacency = isinstance(edge_index, list)

    n_pad = _round_up(max(num_nodes, _LANE), _LANE)
    f_in = x.shape[1]
    f_in_pad = _round_up(f_in, _LANE)
    # Activations live in bf16 between layers (halves writeback + inter-layer traffic).
    x_pad = (jnp.zeros((n_pad, f_in_pad), jnp.bfloat16)
             .at[:num_nodes, :f_in].set(x.astype(jnp.bfloat16)))

    def a_hat_for(edges):
        return build_normalized_adjacency(edges, num_nodes, n_pad)

    if not layerwise_adjacency:
        a_shared = a_hat_for(edge_index)     # build once, reused by every layer

    # hidden layers: GCNConv -> ReLU -> dropout (dropout=0.0 / eval => identity)
    # TODO(synk): dropout with p>0 in training mode is not implemented (identity here).
    feat_dim = f_in
    for i, (w, b) in enumerate(params[:-1], start=1):
        a_hat = a_hat_for(edge_index[-i]) if layerwise_adjacency else a_shared
        x_pad = gcn_conv_pallas(a_hat, x_pad, w, b, apply_relu=True,
                                out_dtype=jnp.bfloat16)
        feat_dim = w.shape[1]

    node_embeddings = x_pad[:num_nodes, :feat_dim].astype(jnp.float32)

    w, b = params[-1]
    a_hat = a_hat_for(edge_index[0]) if layerwise_adjacency else a_shared
    logits_pad = gcn_conv_pallas(a_hat, x_pad, w, b, apply_relu=False,
                                 out_dtype=jnp.float32)
    logits = logits_pad[:num_nodes, :w.shape[1]]

    # TODO(synk): torch.cuda.memory_allocated() has no TPU/Pallas equivalent.
    memory_alloc = 0.0
    return logits, memory_alloc, node_embeddings


# ---------------------------------------------------------------------------
# Demo
# ---------------------------------------------------------------------------
if __name__ == "__main__":
    key = jax.random.PRNGKey(0)
    k_feat, k_edge, k_param = jax.random.split(key, 3)

    num_nodes = 16
    in_features = 8
    hidden_dims = [32, 16, 4]
    num_edges = 40

    # node features [N, F]
    x = jax.random.normal(k_feat, (num_nodes, in_features), jnp.float32)

    # random directed edges [2, E]
    edge_index = jax.random.randint(k_edge, (2, num_edges), 0, num_nodes, jnp.int32)

    params = init_gcn_params(k_param, in_features, hidden_dims)

    logits, memory_alloc, node_embeddings = gcn_forward(
        params, x, edge_index, num_nodes, dropout=0.0
    )
    jax.block_until_ready(logits)
    jax.block_until_ready(node_embeddings)

    assert logits.shape == (num_nodes, hidden_dims[-1])
    assert node_embeddings.shape == (num_nodes, hidden_dims[-2])
    assert bool(jnp.all(jnp.isfinite(logits)))
    print("KERNEL_OK")
</pallas_src>

<mosaic_0001>
module attributes {stable_mosaic.version = 11 : i64} {
  func.func @_gcn_layer_kernel_w(%arg0: i32, %arg1: i32, %arg2: memref<128x128xbf16, #tpu.memory_space<vmem>>, %arg3: memref<128x128xbf16, #tpu.memory_space<vmem>>, %arg4: memref<128x128xbf16, #tpu.memory_space<vmem>>, %arg5: memref<1x128xf32, #tpu.memory_space<vmem>>, %arg6: memref<128x128xbf16, #tpu.memory_space<vmem>>, %arg7: memref<128x128xf32, #tpu.memory_space<vmem>>) attributes {dimension_semantics = [#tpu.dimension_semantics<parallel>, #tpu.dimension_semantics<arbitrary>], iteration_bounds = array<i64: 1, 1>, scalar_prefetch = 0 : i64, scratch_operands = 1 : i64, tpu.core_type = #tpu.core_type<tc>, window_params = [{transform_indices = @transform_0, window_bounds = array<i64: 128, 128>}, {pipeline_mode = #tpu.pipeline_mode<synchronous>, transform_indices = @transform_1, window_bounds = array<i64: 128, 128>}, {pipeline_mode = #tpu.pipeline_mode<synchronous>, transform_indices = @transform_2, window_bounds = array<i64: 128, 128>}, {pipeline_mode = #tpu.pipeline_mode<synchronous>, transform_indices = @transform_3, window_bounds = array<i64: 1, 128>}, {transform_indices = @transform_4, window_bounds = array<i64: 128, 128>}]} {
    %c0_i32 = arith.constant 0 : i32
    %0 = arith.cmpi eq, %arg1, %c0_i32 : i32
    %1 = arith.extui %0 : i1 to i32
    %c0_i32_0 = arith.constant 0 : i32
    %2 = arith.cmpi ne, %1, %c0_i32_0 : i32
    scf.if %2 {
      %cst_9 = arith.constant 0.000000e+00 : f32
      %15 = vector.broadcast %cst_9 : f32 to vector<128x128xf32>
      %c0_10 = arith.constant 0 : index
      %c0_11 = arith.constant 0 : index
      %16 = vector.load %arg7[%c0_10, %c0_11] : memref<128x128xf32, #tpu.memory_space<vmem>>, vector<128x128xf32>
      tpu.vector_store %arg7[%c0_10, %c0_11], %15 {strides = array<i32>} : memref<128x128xf32, #tpu.memory_space<vmem>>, vector<128x128xf32>,
    } else {
    }
    %c128_i32 = arith.constant 128 : i32
    %3 = arith.muli %arg1, %c128_i32 : i32
    %4 = tpu.assume_multiple %3, 128 : i32
    %5 = arith.index_cast %4 : i32 to index
    %c0 = arith.constant 0 : index
    %6 = vector.load %arg3[%5, %c0] : memref<128x128xbf16, #tpu.memory_space<vmem>>, vector<128x128xbf16>
    %c0_1 = arith.constant 0 : index
    %c0_2 = arith.constant 0 : index
    %7 = vector.load %arg7[%c0_1, %c0_2] : memref<128x128xf32, #tpu.memory_space<vmem>>, vector<128x128xf32>
    %c0_3 = arith.constant 0 : index
    %c0_4 = arith.constant 0 : index
    %8 = vector.load %arg2[%c0_3, %c0_4] : memref<128x128xbf16, #tpu.memory_space<vmem>>, vector<128x128xbf16>
    %cst = arith.constant dense<0.000000e+00> : vector<128x128xf32>
    %9 = tpu.matmul %8, %6, %cst {dimension_numbers = #tpu.dot_dimension_numbers<[1], [0], [0], [1], [0, 0, 1, 1], [], []>} : vector<128x128xbf16>, vector<128x128xbf16>, vector<128x128xf32> -> vector<128x128xf32>
    %10 = arith.addf %7, %9 : vector<128x128xf32>
    %c0_5 = arith.constant 0 : index
    %c0_6 = arith.constant 0 : index
    %11 = vector.load %arg7[%c0_5, %c0_6] : memref<128x128xf32, #tpu.memory_space<vmem>>, vector<128x128xf32>
    tpu.vector_store %arg7[%c0_5, %c0_6], %10 {strides = array<i32>} : memref<128x128xf32, #tpu.memory_space<vmem>>, vector<128x128xf32>,
    %c0_i32_7 = arith.constant 0 : i32
    %12 = arith.cmpi eq, %arg1, %c0_i32_7 : i32
    %13 = arith.extui %12 : i1 to i32
    %c0_i32_8 = arith.constant 0 : i32
    %14 = arith.cmpi ne, %13, %c0_i32_8 : i32
    scf.if %14 {
      %c0_9 = arith.constant 0 : index
      %c0_10 = arith.constant 0 : index
      %15 = vector.load %arg7[%c0_9, %c0_10] : memref<128x128xf32, #tpu.memory_space<vmem>>, vector<128x128xf32>
      %16 = arith.truncf %15 : vector<128x128xf32> to vector<128x128xbf16>
      %c0_11 = arith.constant 0 : index
      %c0_12 = arith.constant 0 : index
      %17 = vector.load %arg4[%c0_11, %c0_12] : memref<128x128xbf16, #tpu.memory_space<vmem>>, vector<128x128xbf16>
      %cst_13 = arith.constant dense<0.000000e+00> : vector<128x128xf32>
      %18 = tpu.matmul %16, %17, %cst_13 {dimension_numbers = #tpu.dot_dimension_numbers<[1], [0], [0], [1], [0, 0, 1, 1], [], []>} : vector<128x128xbf16>, vector<128x128xbf16>, vector<128x128xf32> -> vector<128x128xf32>
      %c0_14 = arith.constant 0 : index
      %c0_15 = arith.constant 0 : index
      %19 = vector.load %arg5[%c0_14, %c0_15] : memref<1x128xf32, #tpu.memory_space<vmem>>, vector<1x128xf32>
      %20 = vector.broadcast %19 : vector<1x128xf32> to vector<128x128xf32>
      %21 = arith.addf %18, %20 : vector<128x128xf32>
      %cst_16 = arith.constant 0.000000e+00 : f32
      %22 = vector.broadcast %cst_16 : f32 to vector<128x128xf32>
      %23 = arith.maximumf %21, %22 : vector<128x128xf32>
      %24 = arith.truncf %23 : vector<128x128xf32> to vector<128x128xbf16>
      %c0_17 = arith.constant 0 : index
      %c0_18 = arith.constant 0 : index
      %25 = vector.load %arg6[%c0_17, %c0_18] : memref<128x128xbf16, #tpu.memory_space<vmem>>, vector<128x128xbf16>
      tpu.vector_store %arg6[%c0_17, %c0_18], %24 {strides = array<i32>} : memref<128x128xbf16, #tpu.memory_space<vmem>>, vector<128x128xbf16>,
    } else {
    }
    return
  }
  func.func @transform_0(%arg0: i32, %arg1: i32) -> (i32, i32) {
    %c0_i32 = arith.constant 0 : i32
    return %arg0, %arg1 : i32, i32
  }
  func.func @transform_1(%arg0: i32, %arg1: i32) -> (i32, i32) {
    %c0_i32 = arith.constant 0 : i32
    %c0_i32_0 = arith.constant 0 : i32
    %c0_i32_1 = arith.constant 0 : i32
    return %c0_i32, %c0_i32_0 : i32, i32
  }
  func.func @transform_2(%arg0: i32, %arg1: i32) -> (i32, i32) {
    %c0_i32 = arith.constant 0 : i32
    %c0_i32_0 = arith.constant 0 : i32
    %c0_i32_1 = arith.constant 0 : i32
    return %c0_i32, %c0_i32_0 : i32, i32
  }
  func.func @transform_3(%arg0: i32, %arg1: i32) -> (i32, i32) {
    %c0_i32 = arith.constant 0 : i32
    %c0_i32_0 = arith.constant 0 : i32
    %c0_i32_1 = arith.constant 0 : i32
    return %c0_i32, %c0_i32_0 : i32, i32
  }
  func.func @transform_4(%arg0: i32, %arg1: i32) -> (i32, i32) {
    %c0_i32 = arith.constant 0 : i32
    %c0_i32_0 = arith.constant 0 : i32
    return %arg0, %c0_i32 : i32, i32
  }
}

</mosaic_0001>

<bundles_post_ra>
// kernel: tpu_custom_call.1
= control target key start
LH: loop header
LB: loop body
LE: loop exit
PB: predicated region body
PF: predicated region fallthrough
CT: control target
= control target key end

     0   :  { %9 = vsyncpa [#allocation4], 0  ;;  %s879_s0 = inlined_call_operand.hbm [shape: bf16[128,128], index: 0, kind: input, shape index: {}]   ;;  %s880_s1 = inlined_call_operand.hbm [shape: bf16[128,128], index: 1, kind: input, shape index: {}]   ;;  %s881_s2 = inlined_call_operand.hbm [shape: bf16[128,128], index: 2, kind: input, shape index: {}]   ;;  %s882_s3 = inlined_call_operand.vmem [shape: f32[1,128], index: 3, kind: input, shape index: {}]   ;;  %s883_s4 = inlined_call_operand.hbm [shape: bf16[128,128], index: 4, kind: output, shape index: {}]  }
   0x1   :  { %10 = vsyncpa [#allocation7], 0 }
   0x2   :  { %11 = vsyncpa [#allocation5], 0  ;;  %s29_s17 = sshll.u32 %s880_s1, 4  ;;  %s821_s18 = smov [#allocation6]   ;;  %s30_s17 = int_to_ptr.hbm [resolvable:$true] %s29_s17 }
   0x3   :  { %s31_s19 = sshll.u32 %s821_s18, 4  ;;  %s16_s22 = sshll.u32 %s879_s0, 4  ;;  %s32_s19 = int_to_ptr.vmem [resolvable:$true] %s31_s19  ;;  %s17_s22 = int_to_ptr.hbm [resolvable:$true] %s16_s22 }
   0x4   :  { %s822_s23 = smov 64   ;;  %s823_s24 = smov 4  }
   0x5   :  { %37 = dma.hbm_to_vmem [thread:$0]  %s30_s17, 1024, %s32_s19, [#allocation7], %s822_s23, %s822_s23, %s823_s24  }
   0x6   :  { %s824_s25 = smov [#allocation3]   ;;  %s42_s1 = sshll.u32 %s881_s2, 4  ;;  %s43_s1 = int_to_ptr.hbm [resolvable:$true] %s42_s1 }
   0x7   :  { %s18_s26 = sshll.u32 %s824_s25, 4  ;;  %s825_s0 = smov [#allocation8]   ;;  %s19_s26 = int_to_ptr.vmem [resolvable:$true] %s18_s26 }
   0x8   :  { %24 = dma.hbm_to_vmem [thread:$0]  %s17_s22, 1024, %s19_s26, [#allocation4], %s822_s23, %s822_s23, %s823_s24  }
   0x9   :  { %s44_s29 = sshll.u32 %s825_s0, 4  ;;  %s45_s29 = int_to_ptr.vmem [resolvable:$true] %s44_s29 }
   0xa   :  { %50 = dma.hbm_to_vmem [thread:$0]  %s43_s1, 1024, %s45_s29, [#allocation7], %s822_s23, %s822_s23, %s823_s24  }
   0xb   :  { %815 = dma.done.wait [#allocation4], 1024  }
   0xc   :  { %816 = vsyncadd [#allocation4], 4294966272 }
   0xd   :  { %817 = dma.done.wait [#allocation7], 2048  }
   0xe   :  { %818 = vsyncadd [#allocation7], 4294965248  ;;  %v632_v0 = vld [vmem:[#allocation6 + $0x38] sm:$0xff]  ;;  %v631_v1 = vld [vmem:[#allocation6 + $0x30] sm:$0xff]  ;;  %s513_s8 = sshll.u32 %s883_s4, 4  ;;  %s514_s8 = int_to_ptr.hbm [resolvable:$true] %s513_s8 }
   0xf   :  { %234 = vmatpush.bf16.msra.mxu0 %v632_v0  ;;  %696 = vmatpush.bf16.msra.mxu2 %v632_v0  ;;  %v630_v2 = vld [vmem:[#allocation6 + $0x28] sm:$0xff]  ;;  %v629_v3 = vld [vmem:[#allocation6 + $0x20] sm:$0xff]  ;;  %v628_v4 = vld [vmem:[#allocation6 + $0x18] sm:$0xff] }
  0x10   :  { %v627_v5 = vld [vmem:[#allocation6 + $0x10] sm:$0xff]  ;;  %v626_v6 = vld [vmem:[#allocation6 + $0x8] sm:$0xff]  ;;  %v625_v7 = vld [vmem:[#allocation6] sm:$0xff] }
  0x11   :  { %v633_v8 = vld [vmem:[#allocation3] sm:$0xff]  ;;  %v634_v10 = vld [vmem:[#allocation3 + $0x8] sm:$0xff]  ;;  %v648_v12 = vld [vmem:[#allocation8 + $0x38] sm:$0xff] }
  0x12   :  { %v637_v9 = vld [vmem:[#allocation3 + $0x20] sm:$0xff]  ;;  %v638_v11 = vld [vmem:[#allocation3 + $0x28] sm:$0xff]  ;;  %410 = vmatpush.bf16.msra.mxu1 %v648_v12  ;;  %v647_v13 = vld [vmem:[#allocation8 + $0x30] sm:$0xff]  ;;  %704 = vmatpush.bf16.msra.mxu3 %v648_v12 }
  0x13   :  { %235 = vmatpush.bf16.msra.mxu0 %v631_v1  ;;  %697 = vmatpush.bf16.msra.mxu2 %v631_v1  ;;  %v646_v14 = vld [vmem:[#allocation8 + $0x28] sm:$0xff]  ;;  %v645_v15 = vld [vmem:[#allocation8 + $0x20] sm:$0xff]  ;;  %v635_v16 = vld [vmem:[#allocation3 + $0x10] sm:$0xff] }
  0x14   :  { %v639_v17 = vld [vmem:[#allocation3 + $0x30] sm:$0xff]  ;;  %v644_v18 = vld [vmem:[#allocation8 + $0x18] sm:$0xff]  ;;  %v642_v22 = vld [vmem:[#allocation8 + $0x8] sm:$0xff] }
  0x15   :  { %v636_v19 = vld [vmem:[#allocation3 + $0x18] sm:$0xff]  ;;  %v643_v21 = vld [vmem:[#allocation8 + $0x10] sm:$0xff]  ;;  %v641_v23 = vld [vmem:[#allocation8] sm:$0xff] }
  0x16   :  { %411 = vmatpush.bf16.msra.mxu1 %v647_v13  ;;  %705 = vmatpush.bf16.msra.mxu3 %v647_v13  ;;  %v640_v20 = vld [vmem:[#allocation3 + $0x38] sm:$0xff]  ;;  %v718_v49 = vld [vmem:[%s882_s3] ss:$0 sm:$0xff]  ;;  %s826_s3 = smov [#allocation9]  }
  0x17   :  { %236 = vmatpush.bf16.msra.mxu0 %v630_v2  ;;  %698 = vmatpush.bf16.msra.mxu2 %v630_v2  ;;  %s511_s5 = sshll.u32 %s826_s3, 4  ;;  %s512_s5 = int_to_ptr.vmem [resolvable:$true] %s511_s5 }
  0x1a   :  { %412 = vmatpush.bf16.msra.mxu1 %v646_v14  ;;  %706 = vmatpush.bf16.msra.mxu3 %v646_v14 }
  0x1b   :  { %237 = vmatpush.bf16.msra.mxu0 %v629_v3  ;;  %699 = vmatpush.bf16.msra.mxu2 %v629_v3 }
  0x1e   :  { %413 = vmatpush.bf16.msra.mxu1 %v645_v15  ;;  %707 = vmatpush.bf16.msra.mxu3 %v645_v15 }
  0x1f   :  { %238 = vmatpush.bf16.msra.mxu0 %v628_v4  ;;  %700 = vmatpush.bf16.msra.mxu2 %v628_v4 }
  0x22   :  { %414 = vmatpush.bf16.msra.mxu1 %v644_v18  ;;  %708 = vmatpush.bf16.msra.mxu3 %v644_v18 }
  0x23   :  { %239 = vmatpush.bf16.msra.mxu0 %v627_v5  ;;  %701 = vmatpush.bf16.msra.mxu2 %v627_v5 }
  0x26   :  { %415 = vmatpush.bf16.msra.mxu1 %v643_v21  ;;  %709 = vmatpush.bf16.msra.mxu3 %v643_v21 }
  0x27   :  { %240 = vmatpush.bf16.msra.mxu0 %v626_v6  ;;  %702 = vmatpush.bf16.msra.mxu2 %v626_v6 }
  0x2a   :  { %416 = vmatpush.bf16.msra.mxu1 %v642_v22  ;;  %710 = vmatpush.bf16.msra.mxu3 %v642_v22 }
  0x2b   :  { %241 = vmatpush.bf16.msra.mxu0 %v625_v7  ;;  %703 = vmatpush.bf16.msra.mxu2 %v625_v7 }
  0x2e   :  { %242 = vmatmul.bf16.vlgmr.msra.gmra.mxu0 %v633_v8  ;;  %262 = vmatmul.bf16.vlgmr.msra.gmra.mxu2 %v637_v9 }
  0x2f   :  { %417 = vmatpush.bf16.msra.mxu1 %v641_v23  ;;  %711 = vmatpush.bf16.msra.mxu3 %v641_v23 }
  0x3e   :  { %247 = vmatmul.bf16.gmra.mxu0 %v634_v10  ;;  %267 = vmatmul.bf16.gmra.mxu2 %v638_v11 }
  0x4e   :  { %252 = vmatmul.bf16.gmra.mxu0 %v635_v16  ;;  %272 = vmatmul.bf16.gmra.mxu2 %v639_v17 }
  0x5e   :  { %257 = vmatmul.bf16.gmra.mxu0 %v636_v19  ;;  %277 = vmatmul.bf16.gmra.mxu2 %v640_v20 }
  0xab   :  { %v243_v24 = vpop.f32.mrf.mxu0 }
  0xb1   :  { %v263_v25 = vpop.f32.mrf.mxu2 }
  0xb3   :  { %v245_v26 = vpop.f32.mrf.mxu0 }
  0xb4   :  { %v334_v27 = vpack.c.bf16 %v245_v26, %v243_v24 }
  0xb6   :  { %418 = vmatmul.bf16.vlgmr.msra.gmra.mxu1 %v334_v27 }
  0xb9   :  { %v265_v28 = vpop.f32.mrf.mxu2 }
  0xba   :  { %v338_v29 = vpack.c.bf16 %v265_v28, %v263_v25 }
  0xbb   :  { %v248_v30 = vpop.f32.mrf.mxu0 }
  0xbc   :  { %438 = vmatmul.bf16.vlgmr.msra.gmra.mxu3 %v338_v29 }
  0xc1   :  { %v268_v31 = vpop.f32.mrf.mxu2 }
  0xc3   :  { %v250_v32 = vpop.f32.mrf.mxu0 }
  0xc4   :  { %v335_v33 = vpack.c.bf16 %v250_v32, %v248_v30 }
  0xc6   :  { %423 = vmatmul.bf16.gmra.mxu1 %v335_v33 }
  0xc9   :  { %v270_v34 = vpop.f32.mrf.mxu2 }
  0xca   :  { %v339_v35 = vpack.c.bf16 %v270_v34, %v268_v31 }
  0xcb   :  { %v253_v36 = vpop.f32.mrf.mxu0 }
  0xcc   :  { %443 = vmatmul.bf16.gmra.mxu3 %v339_v35 }
  0xd1   :  { %v273_v37 = vpop.f32.mrf.mxu2 }
  0xd3   :  { %v255_v38 = vpop.f32.mrf.mxu0 }
  0xd4   :  { %v336_v39 = vpack.c.bf16 %v255_v38, %v253_v36 }
  0xd6   :  { %428 = vmatmul.bf16.gmra.mxu1 %v336_v39 }
  0xd9   :  { %v275_v40 = vpop.f32.mrf.mxu2 }
  0xda   :  { %v340_v41 = vpack.c.bf16 %v275_v40, %v273_v37 }
  0xdb   :  { %v258_v42 = vpop.f32.mrf.mxu0 }
  0xdc   :  { %448 = vmatmul.bf16.gmra.mxu3 %v340_v41 }
  0xe1   :  { %v278_v43 = vpop.f32.mrf.mxu2 }
  0xe3   :  { %v260_v44 = vpop.f32.mrf.mxu0 }
  0xe4   :  { %v337_v45 = vpack.c.bf16 %v260_v44, %v258_v42 }
  0xe6   :  { %433 = vmatmul.bf16.gmra.mxu1 %v337_v45 }
  0xe9   :  { %v280_v46 = vpop.f32.mrf.mxu2 }
  0xea   :  { %v341_v47 = vpack.c.bf16 %v280_v46, %v278_v43 }
  0xec   :  { %453 = vmatmul.bf16.gmra.mxu3 %v341_v47 }
 0x133   :  { %v419_v48 = vpop.f32.mrf.mxu1 }
 0x134   :  { %v420_v50 = vadd.f32 %v718_v49, %v419_v48 }
 0x136   :  { %v459_v53 = vmax.f32 %v420_v50, 0.0 }
 0x13b   :  { %v421_v51 = vpop.f32.mrf.mxu1 }
 0x13c   :  { %v422_v52 = vadd.f32 %v718_v49, %v421_v51 }
 0x13e   :  { %v460_v54 = vmax.f32 %v422_v52, 0.0 }
 0x13f   :  { %v439_v55 = vpop.f32.mrf.mxu3 }
 0x140   :  { %v652_v56 = vpack.c.bf16 %v460_v54, %v459_v53  ;;  %v440_v58 = vadd.f32 %v718_v49, %v439_v55 }
 0x142   :  { %653 = vst [vmem:[#allocation9] sm:$0xff] %v652_v56   ;;  %v467_v61 = vmax.f32 %v440_v58, 0.0 }
 0x143   :  { %v424_v57 = vpop.f32.mrf.mxu1 }
 0x144   :  { %v425_v62 = vadd.f32 %v718_v49, %v424_v57 }
 0x146   :  { %v461_v3 = vmax.f32 %v425_v62, 0.0 }
 0x147   :  { %v441_v59 = vpop.f32.mrf.mxu3 }
 0x148   :  { %v442_v60 = vadd.f32 %v718_v49, %v441_v59 }
 0x14a   :  { %v468_v63 = vmax.f32 %v442_v60, 0.0 }
 0x14b   :  { %v426_v0 = vpop.f32.mrf.mxu1 }
 0x14c   :  { %v672_v1 = vpack.c.bf16 %v468_v63, %v467_v61  ;;  %v427_v2 = vadd.f32 %v718_v49, %v426_v0 }
 0x14e   :  { %692 = vst [vmem:[#allocation9 + $0x20] sm:$0xff] %v672_v1   ;;  %v462_v4 = vmax.f32 %v427_v2, 0.0 }
 0x14f   :  { %v444_v5 = vpop.f32.mrf.mxu3 }
 0x150   :  { %v657_v6 = vpack.c.bf16 %v462_v4, %v461_v3  ;;  %v445_v8 = vadd.f32 %v718_v49, %v444_v5 }
 0x152   :  { %689 = vst [vmem:[#allocation9 + $0x8] sm:$0xff] %v657_v6   ;;  %v469_v11 = vmax.f32 %v445_v8, 0.0 }
 0x153   :  { %v429_v7 = vpop.f32.mrf.mxu1 }
 0x154   :  { %v430_v12 = vadd.f32 %v718_v49, %v429_v7 }
 0x156   :  { %v463_v17 = vmax.f32 %v430_v12, 0.0 }
 0x157   :  { %v446_v9 = vpop.f32.mrf.mxu3 }
 0x158   :  { %v447_v10 = vadd.f32 %v718_v49, %v446_v9 }
 0x15a   :  { %v470_v13 = vmax.f32 %v447_v10, 0.0 }
 0x15b   :  { %v431_v14 = vpop.f32.mrf.mxu1 }
 0x15c   :  { %v677_v15 = vpack.c.bf16 %v470_v13, %v469_v11  ;;  %v432_v16 = vadd.f32 %v718_v49, %v431_v14 }
 0x15e   :  { %693 = vst [vmem:[#allocation9 + $0x28] sm:$0xff] %v677_v15   ;;  %v464_v18 = vmax.f32 %v432_v16, 0.0 }
 0x15f   :  { %v449_v19 = vpop.f32.mrf.mxu3 }
 0x160   :  { %v662_v20 = vpack.c.bf16 %v464_v18, %v463_v17  ;;  %v450_v22 = vadd.f32 %v718_v49, %v449_v19 }
 0x162   :  { %690 = vst [vmem:[#allocation9 + $0x10] sm:$0xff] %v662_v20   ;;  %v471_v25 = vmax.f32 %v450_v22, 0.0 }
 0x163   :  { %v434_v21 = vpop.f32.mrf.mxu1 }
 0x164   :  { %v435_v26 = vadd.f32 %v718_v49, %v434_v21 }
 0x166   :  { %v465_v31 = vmax.f32 %v435_v26, 0.0 }
 0x167   :  { %v451_v23 = vpop.f32.mrf.mxu3 }
 0x168   :  { %v452_v24 = vadd.f32 %v718_v49, %v451_v23 }
 0x16a   :  { %v472_v27 = vmax.f32 %v452_v24, 0.0 }
 0x16b   :  { %v436_v28 = vpop.f32.mrf.mxu1 }
 0x16c   :  { %v682_v29 = vpack.c.bf16 %v472_v27, %v471_v25  ;;  %v437_v30 = vadd.f32 %v718_v49, %v436_v28 }
 0x16e   :  { %694 = vst [vmem:[#allocation9 + $0x30] sm:$0xff] %v682_v29   ;;  %v466_v32 = vmax.f32 %v437_v30, 0.0 }
 0x16f   :  { %v454_v33 = vpop.f32.mrf.mxu3 }
 0x170   :  { %v667_v34 = vpack.c.bf16 %v466_v32, %v465_v31  ;;  %v455_v35 = vadd.f32 %v718_v49, %v454_v33 }
 0x172   :  { %691 = vst [vmem:[#allocation9 + $0x18] sm:$0xff] %v667_v34   ;;  %v473_v38 = vmax.f32 %v455_v35, 0.0 }
 0x177   :  { %v456_v36 = vpop.f32.mrf.mxu3 }
 0x178   :  { %v457_v37 = vadd.f32 %v718_v49, %v456_v36 }
 0x17a   :  { %v474_v39 = vmax.f32 %v457_v37, 0.0 }
 0x17c   :  { %v687_v40 = vpack.c.bf16 %v474_v39, %v473_v38 }
 0x17e   :  { %695 = vst [vmem:[#allocation9 + $0x38] sm:$0xff] %v687_v40  }
 0x17f   :  { %519 = dma.vmem_to_hbm [thread:$0]  %s512_s5, 1024, %s514_s8, [#allocation5], %s822_s23, %s822_s23, %s823_s24  }
 0x180   :  { %819 = dma.done.wait [#allocation5], 1024  }
 0x181   :  { %820 = vsyncadd [#allocation5], 4294966272 }
 0x182   :  { %524 = vsyncpa [#allocation4], 1 }
 0x183   :  { %525 = vsyncpa [#allocation7], 1 }
 0x184   :  { %526 = vsyncpa [#allocation5], 1 }

</bundles_post_ra>
